<compile_context>
chip_gen: v6e
topology: v6e:2x2x1
jax: 0.10.0
libtpu: 0.0.40
codegen_flags: <defaults>
</compile_context>

<pallas_src>
import functools

import jax
import jax.numpy as jnp
from jax.experimental import pallas as pl
from jax.experimental.pallas import tpu as pltpu  # noqa: F401  (TPU backend)


def _block_kernel(x_ref, w1_ref, b1_ref, w2_ref, b2_ref, o_ref, *, B, H1, H2):
    """Fused conv3x3 -> ReLU -> conv3x3 for the whole batch (no grid).

    x_ref : (B,  H,  W*Cin)         VMEM, lane-dense input rows
    w1_ref: (3,  W*Cin,   W1*Cmid)  VMEM, banded conv1 weights (one per kh)
    b1_ref: (1,  W1*Cmid)           VMEM, conv1 bias tiled across W1
    w2_ref: (3,  W1*Cmid, W2*Cout)  VMEM, banded conv2 weights (one per kh)
    b2_ref: (1,  W2*Cout)           VMEM, conv2 bias tiled across W2
    o_ref : (B*H2, W2*Cout)         VMEM, lane-dense output rows
    """
    x = x_ref[...]                      # (B, H, W*Cin)
    K1 = x.shape[-1]                    # W  * Cin
    K2 = w2_ref.shape[1]                # W1 * Cmid

    def conv_rows(src, w_ref, h_out, k):
        # src: (B, h_in, k).  3 matmuls, one per kernel row; the width taps
        # are already folded into the banded weight matrix.
        acc = jnp.dot(src[:, 0:h_out, :].reshape(B * h_out, k), w_ref[0],
                      preferred_element_type=jnp.float32)
        for kh in range(1, 3):
            acc = acc + jnp.dot(
                src[:, kh:kh + h_out, :].reshape(B * h_out, k), w_ref[kh],
                preferred_element_type=jnp.float32)
        return acc

    # conv1 + bias + ReLU -> (B*H1, W1*Cmid); bias added once after accum.
    h = jnp.maximum(conv_rows(x, w1_ref, H1, K1) + b1_ref[...], 0.0)

    # conv2 + bias -> (B*H2, W2*Cout); reshape only splits the leading dim.
    y = conv_rows(h.reshape(B, H1, K2), w2_ref, H2, K2) + b2_ref[...]

    o_ref[...] = y.astype(o_ref.dtype)


def _band_weights(w_hwio, w_in, w_out):
    """Fold the width axis of a 3x3 conv into a banded (Toeplitz) matrix.

    w_hwio: (3, 3, Ci, Co) HWIO weights.
    Returns W_band of shape (3, w_in*Ci, w_out*Co) with
        W_band[kh, wi*Ci + ci, wo*Co + co] = w_hwio[kh, wi - wo, ci, co]
    when 0 <= wi - wo < 3, else 0, so that for each kernel row kh
        (rows, w_in*Ci) @ W_band[kh]  ==  1-D valid conv over the width axis.
    """
    kh_sz, kw_sz, ci, co = w_hwio.shape
    tap = jnp.arange(w_in)[:, None] - jnp.arange(w_out)[None, :]   # (w_in, w_out)
    valid = (tap >= 0) & (tap < kw_sz)
    band = w_hwio[:, jnp.clip(tap, 0, kw_sz - 1)]        # (3, w_in, w_out, Ci, Co)
    band = jnp.where(valid[None, :, :, None, None], band, 0.0)
    band = band.transpose(0, 1, 3, 2, 4)                  # (3, w_in, Ci, w_out, Co)
    return band.reshape(kh_sz, w_in * ci, w_out * co)


@jax.jit
def block_forward(x_nchw, w1, b1, w2, b2):
    """PyTorch-semantics Block forward.

    x_nchw: (B, Cin, H, W) float32
    w1    : (3, 3, Cin,  Cmid)  (HWIO)
    b1    : (Cmid,)
    w2    : (3, 3, Cmid, Cout)  (HWIO)
    b2    : (Cout,)
    returns (B, Cout, H-4, W-4) float32
    """
    B, Cin, H, W = x_nchw.shape
    Cmid = w1.shape[-1]
    Cout = w2.shape[-1]
    H1, W1 = H - 2, W - 2
    H2, W2 = H1 - 2, W1 - 2

    # Lane-dense input layout: (B, H, W*Cin) -> last dim 64 instead of 4.
    x_rows = jnp.transpose(x_nchw, (0, 2, 3, 1)).reshape(B, H, W * Cin)

    # Pre-flatten weights (banded over the width axis) and tile the biases in
    # the wrapper so the kernel does pure matmul + one VPU add per conv.
    w1_band = _band_weights(w1, W, W1)                    # (3, W*Cin,   W1*Cmid)
    w2_band = _band_weights(w2, W1, W2)                   # (3, W1*Cmid, W2*Cout)
    b1_row = jnp.tile(b1, W1).reshape(1, W1 * Cmid)
    b2_row = jnp.tile(b2, W2).reshape(1, W2 * Cout)

    kernel = functools.partial(_block_kernel, B=B, H1=H1, H2=H2)

    # Single invocation, whole batch resident in VMEM (<1 MiB total); no grid,
    # no BlockSpec tiling needed at these shapes.
    out_rows = pl.pallas_call(
        kernel,
        out_shape=jax.ShapeDtypeStruct((B * H2, W2 * Cout), x_nchw.dtype),
    )(x_rows, w1_band, b1_row, w2_band, b2_row)

    out_nhwc = out_rows.reshape(B, H2, W2, Cout)
    return jnp.transpose(out_nhwc, (0, 3, 1, 2))          # NHWC -> NCHW


def _reference_forward(x_nchw, w1, b1, w2, b2):
    """Pure-JAX reference (mirrors torch Conv2d semantics, valid padding)."""
    def conv(x, w_hwio, b):
        y = jax.lax.conv_general_dilated(
            x, w_hwio, window_strides=(1, 1), padding="VALID",
            dimension_numbers=("NCHW", "HWIO", "NCHW"))
        return y + b.reshape(1, -1, 1, 1)
    h = jnp.maximum(conv(x_nchw, w1, b1), 0.0)
    return conv(h, w2, b2)


if __name__ == "__main__":
    # Small shapes consistent with the module: Block(inChannels=4, outChannels=8)
    B, Cin, H, W = 2, 4, 16, 16
    Cmid = Cout = 8

    key = jax.random.PRNGKey(0)
    k_x, k_w1, k_b1, k_w2, k_b2 = jax.random.split(key, 5)

    x = jax.random.normal(k_x, (B, Cin, H, W), dtype=jnp.float32)
    # Deterministic synthetic parameters (shapes match nn.Conv2d(Cin, C, 3)).
    w1 = jax.random.normal(k_w1, (3, 3, Cin, Cmid), dtype=jnp.float32) * 0.1
    b1 = jax.random.normal(k_b1, (Cmid,), dtype=jnp.float32) * 0.1
    w2 = jax.random.normal(k_w2, (3, 3, Cmid, Cout), dtype=jnp.float32) * 0.1
    b2 = jax.random.normal(k_b2, (Cout,), dtype=jnp.float32) * 0.1

    out = jax.block_until_ready(block_forward(x, w1, b1, w2, b2))
    ref = jax.block_until_ready(_reference_forward(x, w1, b1, w2, b2))

    assert out.shape == (B, Cout, H - 4, W - 4), out.shape
    assert jnp.allclose(out, ref, atol=1e-4, rtol=1e-4), float(
        jnp.max(jnp.abs(out - ref)))

    print("KERNEL_OK")
</pallas_src>

<mosaic_0001>
module attributes {stable_mosaic.version = 11 : i64} {
  func.func @_block_kernel(%arg0: memref<2x16x64xf32, #tpu.memory_space<vmem>>, %arg1: memref<3x64x112xf32, #tpu.memory_space<vmem>>, %arg2: memref<1x112xf32, #tpu.memory_space<vmem>>, %arg3: memref<3x112x96xf32, #tpu.memory_space<vmem>>, %arg4: memref<1x96xf32, #tpu.memory_space<vmem>>, %arg5: memref<24x96xf32, #tpu.memory_space<vmem>>) attributes {dimension_semantics = [], scalar_prefetch = 0 : i64, scratch_operands = 0 : i64, tpu.core_type = #tpu.core_type<tc>} {
    %c0 = arith.constant 0 : index
    %c0_0 = arith.constant 0 : index
    %c0_1 = arith.constant 0 : index
    %0 = vector.load %arg0[%c0, %c0_0, %c0_1] : memref<2x16x64xf32, #tpu.memory_space<vmem>>, vector<2x16x64xf32>
    %1 = vector.extract_strided_slice %0 {offsets = [0, 0, 0], sizes = [2, 14, 64], strides = [1, 1, 1]} : vector<2x16x64xf32> to vector<2x14x64xf32>
    %2 = vector.shape_cast %1 : vector<2x14x64xf32> to vector<28x64xf32>
    %c0_2 = arith.constant 0 : index
    %c0_3 = arith.constant 0 : index
    %c0_4 = arith.constant 0 : index
    %3 = vector.load %arg1[%c0_2, %c0_3, %c0_4] : memref<3x64x112xf32, #tpu.memory_space<vmem>>, vector<1x64x112xf32>
    %4 = vector.shape_cast %3 : vector<1x64x112xf32> to vector<64x112xf32>
    %cst = arith.constant dense<0.000000e+00> : vector<28x112xf32>
    %5 = tpu.matmul %2, %4, %cst {dimension_numbers = #tpu.dot_dimension_numbers<[1], [0], [0], [1], [0, 0, 1, 1], [], []>} : vector<28x64xf32>, vector<64x112xf32>, vector<28x112xf32> -> vector<28x112xf32>
    %6 = vector.extract_strided_slice %0 {offsets = [0, 1, 0], sizes = [2, 14, 64], strides = [1, 1, 1]} : vector<2x16x64xf32> to vector<2x14x64xf32>
    %7 = vector.shape_cast %6 : vector<2x14x64xf32> to vector<28x64xf32>
    %c1 = arith.constant 1 : index
    %c0_5 = arith.constant 0 : index
    %c0_6 = arith.constant 0 : index
    %8 = vector.load %arg1[%c1, %c0_5, %c0_6] : memref<3x64x112xf32, #tpu.memory_space<vmem>>, vector<1x64x112xf32>
    %9 = vector.shape_cast %8 : vector<1x64x112xf32> to vector<64x112xf32>
    %cst_7 = arith.constant dense<0.000000e+00> : vector<28x112xf32>
    %10 = tpu.matmul %7, %9, %cst_7 {dimension_numbers = #tpu.dot_dimension_numbers<[1], [0], [0], [1], [0, 0, 1, 1], [], []>} : vector<28x64xf32>, vector<64x112xf32>, vector<28x112xf32> -> vector<28x112xf32>
    %11 = arith.addf %5, %10 : vector<28x112xf32>
    %12 = vector.extract_strided_slice %0 {offsets = [0, 2, 0], sizes = [2, 14, 64], strides = [1, 1, 1]} : vector<2x16x64xf32> to vector<2x14x64xf32>
    %13 = vector.shape_cast %12 : vector<2x14x64xf32> to vector<28x64xf32>
    %c2 = arith.constant 2 : index
    %c0_8 = arith.constant 0 : index
    %c0_9 = arith.constant 0 : index
    %14 = vector.load %arg1[%c2, %c0_8, %c0_9] : memref<3x64x112xf32, #tpu.memory_space<vmem>>, vector<1x64x112xf32>
    %15 = vector.shape_cast %14 : vector<1x64x112xf32> to vector<64x112xf32>
    %cst_10 = arith.constant dense<0.000000e+00> : vector<28x112xf32>
    %16 = tpu.matmul %13, %15, %cst_10 {dimension_numbers = #tpu.dot_dimension_numbers<[1], [0], [0], [1], [0, 0, 1, 1], [], []>} : vector<28x64xf32>, vector<64x112xf32>, vector<28x112xf32> -> vector<28x112xf32>
    %17 = arith.addf %11, %16 : vector<28x112xf32>
    %c0_11 = arith.constant 0 : index
    %c0_12 = arith.constant 0 : index
    %18 = vector.load %arg2[%c0_11, %c0_12] : memref<1x112xf32, #tpu.memory_space<vmem>>, vector<1x112xf32>
    %19 = vector.broadcast %18 : vector<1x112xf32> to vector<28x112xf32>
    %20 = arith.addf %17, %19 : vector<28x112xf32>
    %cst_13 = arith.constant 0.000000e+00 : f32
    %21 = vector.broadcast %cst_13 : f32 to vector<28x112xf32>
    %22 = arith.maximumf %20, %21 : vector<28x112xf32>
    %23 = vector.shape_cast %22 : vector<28x112xf32> to vector<2x14x112xf32>
    %24 = vector.extract_strided_slice %23 {offsets = [0, 0, 0], sizes = [2, 12, 112], strides = [1, 1, 1]} : vector<2x14x112xf32> to vector<2x12x112xf32>
    %25 = vector.shape_cast %24 : vector<2x12x112xf32> to vector<24x112xf32>
    %c0_14 = arith.constant 0 : index
    %c0_15 = arith.constant 0 : index
    %c0_16 = arith.constant 0 : index
    %26 = vector.load %arg3[%c0_14, %c0_15, %c0_16] : memref<3x112x96xf32, #tpu.memory_space<vmem>>, vector<1x112x96xf32>
    %27 = vector.shape_cast %26 : vector<1x112x96xf32> to vector<112x96xf32>
    %cst_17 = arith.constant dense<0.000000e+00> : vector<24x96xf32>
    %28 = tpu.matmul %25, %27, %cst_17 {dimension_numbers = #tpu.dot_dimension_numbers<[1], [0], [0], [1], [0, 0, 1, 1], [], []>} : vector<24x112xf32>, vector<112x96xf32>, vector<24x96xf32> -> vector<24x96xf32>
    %29 = vector.extract_strided_slice %23 {offsets = [0, 1, 0], sizes = [2, 12, 112], strides = [1, 1, 1]} : vector<2x14x112xf32> to vector<2x12x112xf32>
    %30 = vector.shape_cast %29 : vector<2x12x112xf32> to vector<24x112xf32>
    %c1_18 = arith.constant 1 : index
    %c0_19 = arith.constant 0 : index
    %c0_20 = arith.constant 0 : index
    %31 = vector.load %arg3[%c1_18, %c0_19, %c0_20] : memref<3x112x96xf32, #tpu.memory_space<vmem>>, vector<1x112x96xf32>
    %32 = vector.shape_cast %31 : vector<1x112x96xf32> to vector<112x96xf32>
    %cst_21 = arith.constant dense<0.000000e+00> : vector<24x96xf32>
    %33 = tpu.matmul %30, %32, %cst_21 {dimension_numbers = #tpu.dot_dimension_numbers<[1], [0], [0], [1], [0, 0, 1, 1], [], []>} : vector<24x112xf32>, vector<112x96xf32>, vector<24x96xf32> -> vector<24x96xf32>
    %34 = arith.addf %28, %33 : vector<24x96xf32>
    %35 = vector.extract_strided_slice %23 {offsets = [0, 2, 0], sizes = [2, 12, 112], strides = [1, 1, 1]} : vector<2x14x112xf32> to vector<2x12x112xf32>
    %36 = vector.shape_cast %35 : vector<2x12x112xf32> to vector<24x112xf32>
    %c2_22 = arith.constant 2 : index
    %c0_23 = arith.constant 0 : index
    %c0_24 = arith.constant 0 : index
    %37 = vector.load %arg3[%c2_22, %c0_23, %c0_24] : memref<3x112x96xf32, #tpu.memory_space<vmem>>, vector<1x112x96xf32>
    %38 = vector.shape_cast %37 : vector<1x112x96xf32> to vector<112x96xf32>
    %cst_25 = arith.constant dense<0.000000e+00> : vector<24x96xf32>
    %39 = tpu.matmul %36, %38, %cst_25 {dimension_numbers = #tpu.dot_dimension_numbers<[1], [0], [0], [1], [0, 0, 1, 1], [], []>} : vector<24x112xf32>, vector<112x96xf32>, vector<24x96xf32> -> vector<24x96xf32>
    %40 = arith.addf %34, %39 : vector<24x96xf32>
    %c0_26 = arith.constant 0 : index
    %c0_27 = arith.constant 0 : index
    %41 = vector.load %arg4[%c0_26, %c0_27] : memref<1x96xf32, #tpu.memory_space<vmem>>, vector<1x96xf32>
    %42 = vector.broadcast %41 : vector<1x96xf32> to vector<24x96xf32>
    %43 = arith.addf %40, %42 : vector<24x96xf32>
    %c0_28 = arith.constant 0 : index
    %c0_29 = arith.constant 0 : index
    %44 = vector.load %arg5[%c0_28, %c0_29] : memref<24x96xf32, #tpu.memory_space<vmem>>, vector<24x96xf32>
    tpu.vector_store %arg5[%c0_28, %c0_29], %43 {strides = array<i32>} : memref<24x96xf32, #tpu.memory_space<vmem>>, vector<24x96xf32>,
    return
  }
}

</mosaic_0001>

<bundles_post_ra>
// kernel: tile.13
= control target key start
LH: loop header
LB: loop body
LE: loop exit
PB: predicated region body
PF: predicated region fallthrough
CT: control target
= control target key end

     0   :  { %s28_s0 = inlined_call_operand.vmem [shape: f32[8], index: 0, kind: input, shape index: {}]   ;;  %s29_s1 = inlined_call_operand.vmem [shape: f32[14,8], index: 1, kind: output, shape index: {}]  }
   0x1   :  { %v4_v0 = vld [vmem:[%s28_s0] ss:$0 sm:$0xff] }
   0x2   :  { %5 = vst [vmem:[%s29_s1] sm:$0xff] %v4_v0  ;;  %8 = vst [vmem:[%s29_s1 + $0x8] sm:$0xff] %v4_v0 }

// kernel: tile.14
= control target key start
LH: loop header
LB: loop body
LE: loop exit
PB: predicated region body
PF: predicated region fallthrough
CT: control target
= control target key end

     0   :  { %s117_s10 = smov 104   ;;  %s118_s11 = smov 88   ;;  %vm3_vm0 = vcmask 64512   ;;  %vm9_vm1 = vcmask 917312   ;;  %vm15_vm2 = vcmask 851712   ;;  %vm21_vm3 = vcmask 786112   ;;  %s185_s0 = inlined_call_operand.vmem [shape: f32[14,8], index: 0, kind: input, shape index: {}]   ;;  %s186_s1 = inlined_call_operand.vmem [shape: f32[1,112], index: 1, kind: output, shape index: {}]  }
   0x1   :  { %v91_v0 = vld [vmem:[%s185_s0 + $0xd] sm:$0x1]   ;;  %v93_v1 = vld [vmem:[%s185_s0 + $0xb] sm:$0x1]   ;;  %v92_v2 = vld [vmem:[%s185_s0 + $0xc] sm:$0x1]  }
   0x2   :  { %7 = vrot.lane.b32.xlu0 %v91_v0, %s117_s10  ;;  %19 = vrot.lane.b32.xlu1 %v93_v1, %s118_s11  ;;  %v94_v3 = vld [vmem:[%s185_s0 + $0xa] sm:$0x1]   ;;  %s119_s16 = smov 96   ;;  %s120_s17 = smov 80   ;;  %v95_v4 = vld [vmem:[%s185_s0 + $0x9] sm:$0x1]  }
   0x3   :  { %v96_v5 = vld [vmem:[%s185_s0 + $0x8] sm:$0x1]   ;;  %v2_v6 = vld [vmem:[%s185_s0] sm:$0x1]   ;;  %s121_s24 = smov 72   ;;  %s122_s25 = smov 64  }
   0x4   :  { %4 = vst.msk [vmem:[#allocation0] sm:$0x1] %vm3_vm0, %v2_v6   ;;  %v97_v7 = vld [vmem:[%s185_s0 + $0x7] sm:$0x1]   ;;  %v98_v8 = vld [vmem:[%s185_s0 + $0x6] sm:$0x1]  }
   0x5   :  { %s123_s30 = smov 56   ;;  %s124_s2 = smov 48   ;;  %v99_v9 = vld [vmem:[%s185_s0 + $0x5] sm:$0x1]   ;;  %v100_v10 = vld [vmem:[%s185_s0 + $0x4] sm:$0x1]  }
   0x6   :  { %13 = vrot.lane.b32.xlu0 %v92_v2, %s119_s16  ;;  %25 = vrot.lane.b32.xlu1 %v94_v3, %s120_s17  ;;  %s125_s7 = smov 40   ;;  %s126_s8 = smov 32   ;;  %v101_v11 = vld [vmem:[%s185_s0 + $0x3] sm:$0x1]   ;;  %v102_v12 = vld [vmem:[%s185_s0 + $0x2] sm:$0x1]  }
   0x7   :  { %s127_s13 = smov 24   ;;  %s128_s14 = smov 16   ;;  %v103_v13 = vld [vmem:[%s185_s0 + $0x1] sm:$0x1]   ;;  %vm27_vm4 = vcmask 720512   ;;  %vm33_vm5 = vcmask 654912  }
   0x8   :  { %s129_s0 = smov 8   ;;  %vm39_vm6 = vcmask 589312   ;;  %vm45_vm7 = vcmask 523712   ;;  %vm51_vm8 = vcmask 458112   ;;  %vm57_vm9 = vcmask 392512  }
   0x9   :  { %vm63_vm10 = vcmask 326912   ;;  %vm69_vm11 = vcmask 261312   ;;  %vm75_vm12 = vcmask 195712   ;;  %vm81_vm13 = vcmask 130112  }
   0xa   :  { %31 = vrot.lane.b32.xlu0 %v95_v4, %s121_s24  ;;  %37 = vrot.lane.b32.xlu1 %v96_v5, %s122_s25 }
   0xe   :  { %43 = vrot.lane.b32.xlu0 %v97_v7, %s123_s30  ;;  %49 = vrot.lane.b32.xlu1 %v98_v8, %s124_s2 }
  0x12   :  { %55 = vrot.lane.b32.xlu0 %v99_v9, %s125_s7  ;;  %61 = vrot.lane.b32.xlu1 %v100_v10, %s126_s8 }
  0x16   :  { %67 = vrot.lane.b32.xlu0 %v101_v11, %s127_s13  ;;  %73 = vrot.lane.b32.xlu1 %v102_v12, %s128_s14 }
  0x1a   :  { %79 = vrot.lane.b32.xlu0 %v103_v13, %s129_s0 }
  0x74   :  { %v8_v14 = vpop.permute.xlu0 %7   ;;  %v20_v15 = vpop.permute.xlu1 %19  }
  0x75   :  { %10 = vst.msk [vmem:[#allocation0] sm:$0x1] %vm9_vm1, %v8_v14  }
  0x78   :  { %v14_v16 = vpop.permute.xlu0 %13   ;;  %v26_v17 = vpop.permute.xlu1 %25  }
  0x79   :  { %16 = vst.msk [vmem:[#allocation0] sm:$0x1] %vm15_vm2, %v14_v16  }
  0x7a   :  { %22 = vst.msk [vmem:[#allocation0] sm:$0x1] %vm21_vm3, %v20_v15  }
  0x7b   :  { %28 = vst.msk [vmem:[#allocation0] sm:$0x1] %vm27_vm4, %v26_v17  }
  0x7c   :  { %v32_v18 = vpop.permute.xlu0 %31   ;;  %v38_v19 = vpop.permute.xlu1 %37  }
  0x7d   :  { %34 = vst.msk [vmem:[#allocation0] sm:$0x1] %vm33_vm5, %v32_v18  }
  0x7e   :  { %40 = vst.msk [vmem:[#allocation0] sm:$0x1] %vm39_vm6, %v38_v19  }
  0x80   :  { %v44_v20 = vpop.permute.xlu0 %43   ;;  %v50_v21 = vpop.permute.xlu1 %49  }
  0x81   :  { %46 = vst.msk [vmem:[#allocation0] sm:$0x1] %vm45_vm7, %v44_v20  }
  0x82   :  { %52 = vst.msk [vmem:[#allocation0] sm:$0x1] %vm51_vm8, %v50_v21  }
  0x84   :  { %v56_v22 = vpop.permute.xlu0 %55   ;;  %v62_v23 = vpop.permute.xlu1 %61  }
  0x85   :  { %58 = vst.msk [vmem:[#allocation0] sm:$0x1] %vm57_vm9, %v56_v22  }
  0x86   :  { %64 = vst.msk [vmem:[#allocation0] sm:$0x1] %vm63_vm10, %v62_v23  }
  0x88   :  { %v68_v24 = vpop.permute.xlu0 %67   ;;  %v74_v25 = vpop.permute.xlu1 %73  }
  0x89   :  { %70 = vst.msk [vmem:[#allocation0] sm:$0x1] %vm69_vm11, %v68_v24  }
  0x8a   :  { %76 = vst.msk [vmem:[#allocation0] sm:$0x1] %vm75_vm12, %v74_v25  }
  0x8c   :  { %v80_v26 = vpop.permute.xlu0 %79  }
  0x8d   :  { %82 = vst.msk [vmem:[#allocation0] sm:$0x1] %vm81_vm13, %v80_v26  }
  0x94   :  { %v87_v27 = vld [vmem:[#allocation0] sm:$0x1] }
  0x95   :  { %90 = vst [vmem:[%s186_s1] sm:$0x1] %v87_v27 }

// kernel: tile.18
= control target key start
LH: loop header
LB: loop body
LE: loop exit
PB: predicated region body
PF: predicated region fallthrough
CT: control target
= control target key end

     0   :  { %s28_s0 = inlined_call_operand.vmem [shape: f32[8], index: 0, kind: input, shape index: {}]   ;;  %s29_s1 = inlined_call_operand.vmem [shape: f32[12,8], index: 1, kind: output, shape index: {}]  }
   0x1   :  { %v4_v0 = vld [vmem:[%s28_s0] ss:$0 sm:$0xff] }
   0x2   :  { %5 = vst [vmem:[%s29_s1] sm:$0xff] %v4_v0  ;;  %8 = vst [vmem:[%s29_s1 + $0x8] sm:$0xff] %v4_v0 }

// kernel: tile.19
= control target key start
LH: loop header
LB: loop body
LE: loop exit
PB: predicated region body
PF: predicated region fallthrough
CT: control target
= control target key end

     0   :  { %s101_s10 = smov 88   ;;  %s102_s11 = smov 72   ;;  %vm3_vm0 = vcmask 64512   ;;  %vm9_vm1 = vcmask 786112   ;;  %vm15_vm2 = vcmask 720512   ;;  %vm21_vm3 = vcmask 654912   ;;  %s161_s0 = inlined_call_operand.vmem [shape: f32[12,8], index: 0, kind: input, shape index: {}]   ;;  %s162_s1 = inlined_call_operand.vmem [shape: f32[1,96], index: 1, kind: output, shape index: {}]  }
   0x1   :  { %v79_v0 = vld [vmem:[%s161_s0 + $0xb] sm:$0x1]   ;;  %v81_v1 = vld [vmem:[%s161_s0 + $0x9] sm:$0x1]   ;;  %v80_v2 = vld [vmem:[%s161_s0 + $0xa] sm:$0x1]  }
   0x2   :  { %7 = vrot.lane.b32.xlu0 %v79_v0, %s101_s10  ;;  %19 = vrot.lane.b32.xlu1 %v81_v1, %s102_s11  ;;  %v82_v3 = vld [vmem:[%s161_s0 + $0x8] sm:$0x1]   ;;  %s103_s16 = smov 80   ;;  %s104_s17 = smov 64   ;;  %v83_v4 = vld [vmem:[%s161_s0 + $0x7] sm:$0x1]  }
   0x3   :  { %v2_v5 = vld [vmem:[%s161_s0] sm:$0x1]   ;;  %v84_v6 = vld [vmem:[%s161_s0 + $0x6] sm:$0x1]   ;;  %s105_s24 = smov 56   ;;  %s106_s25 = smov 48  }
   0x4   :  { %4 = vst.msk [vmem:[#allocation0] sm:$0x1] %vm3_vm0, %v2_v5   ;;  %v85_v7 = vld [vmem:[%s161_s0 + $0x5] sm:$0x1]   ;;  %v86_v8 = vld [vmem:[%s161_s0 + $0x4] sm:$0x1]  }
   0x5   :  { %s107_s30 = smov 40   ;;  %s108_s2 = smov 32   ;;  %v87_v9 = vld [vmem:[%s161_s0 + $0x3] sm:$0x1]   ;;  %v88_v10 = vld [vmem:[%s161_s0 + $0x2] sm:$0x1]  }
   0x6   :  { %13 = vrot.lane.b32.xlu0 %v80_v2, %s103_s16  ;;  %25 = vrot.lane.b32.xlu1 %v82_v3, %s104_s17  ;;  %s109_s7 = smov 24   ;;  %s110_s8 = smov 16   ;;  %v89_v11 = vld [vmem:[%s161_s0 + $0x1] sm:$0x1]   ;;  %vm27_vm4 = vcmask 589312   ;;  %vm33_vm5 = vcmask 523712  }
   0x7   :  { %s111_s0 = smov 8   ;;  %vm39_vm6 = vcmask 458112   ;;  %vm45_vm7 = vcmask 392512   ;;  %vm51_vm8 = vcmask 326912   ;;  %vm57_vm9 = vcmask 261312  }
   0x8   :  { %vm63_vm10 = vcmask 195712   ;;  %vm69_vm11 = vcmask 130112  }
   0xa   :  { %31 = vrot.lane.b32.xlu0 %v83_v4, %s105_s24  ;;  %37 = vrot.lane.b32.xlu1 %v84_v6, %s106_s25 }
   0xe   :  { %43 = vrot.lane.b32.xlu0 %v85_v7, %s107_s30  ;;  %49 = vrot.lane.b32.xlu1 %v86_v8, %s108_s2 }
  0x12   :  { %55 = vrot.lane.b32.xlu0 %v87_v9, %s109_s7  ;;  %61 = vrot.lane.b32.xlu1 %v88_v10, %s110_s8 }
  0x16   :  { %67 = vrot.lane.b32.xlu0 %v89_v11, %s111_s0 }
  0x74   :  { %v8_v12 = vpop.permute.xlu0 %7   ;;  %v20_v13 = vpop.permute.xlu1 %19  }
  0x75   :  { %10 = vst.msk [vmem:[#allocation0] sm:$0x1] %vm9_vm1, %v8_v12  }
  0x78   :  { %v14_v14 = vpop.permute.xlu0 %13   ;;  %v26_v15 = vpop.permute.xlu1 %25  }
  0x79   :  { %16 = vst.msk [vmem:[#allocation0] sm:$0x1] %vm15_vm2, %v14_v14  }
  0x7a   :  { %22 = vst.msk [vmem:[#allocation0] sm:$0x1] %vm21_vm3, %v20_v13  }
  0x7b   :  { %28 = vst.msk [vmem:[#allocation0] sm:$0x1] %vm27_vm4, %v26_v15  }
  0x7c   :  { %v32_v16 = vpop.permute.xlu0 %31   ;;  %v38_v17 = vpop.permute.xlu1 %37  }
  0x7d   :  { %34 = vst.msk [vmem:[#allocation0] sm:$0x1] %vm33_vm5, %v32_v16  }
  0x7e   :  { %40 = vst.msk [vmem:[#allocation0] sm:$0x1] %vm39_vm6, %v38_v17  }
  0x80   :  { %v44_v18 = vpop.permute.xlu0 %43   ;;  %v50_v19 = vpop.permute.xlu1 %49  }
  0x81   :  { %46 = vst.msk [vmem:[#allocation0] sm:$0x1] %vm45_vm7, %v44_v18  }
  0x82   :  { %52 = vst.msk [vmem:[#allocation0] sm:$0x1] %vm51_vm8, %v50_v19  }
  0x84   :  { %v56_v20 = vpop.permute.xlu0 %55   ;;  %v62_v21 = vpop.permute.xlu1 %61  }
  0x85   :  { %58 = vst.msk [vmem:[#allocation0] sm:$0x1] %vm57_vm9, %v56_v20  }
  0x86   :  { %64 = vst.msk [vmem:[#allocation0] sm:$0x1] %vm63_vm10, %v62_v21  }
  0x88   :  { %v68_v22 = vpop.permute.xlu0 %67  }
  0x89   :  { %70 = vst.msk [vmem:[#allocation0] sm:$0x1] %vm69_vm11, %v68_v22  }
  0x90   :  { %v75_v23 = vld [vmem:[#allocation0] sm:$0x1] }
  0x91   :  { %78 = vst [vmem:[%s162_s1] sm:$0x1] %v75_v23 }

// kernel: block_forward.1
= control target key start
LH: loop header
LB: loop body
LE: loop exit
PB: predicated region body
PF: predicated region fallthrough
CT: control target
= control target key end

     0   :  { %v32_v0 = vlaneseq  ;;  %v1570_v4 = vmov 1983009808   ;;  %vm104_vm0 = vcmask 1040384   ;;  %vm105_vm1 = vcmask 1042434   ;;  %s2182_s1 = inlined_call_operand.vmem [shape: f32[3,64,112], index: 1, kind: input, shape index: {}]   ;;  %s2183_s0 = inlined_call_operand.vmem [shape: f32[2,16,64], index: 0, kind: input, shape index: {}]   ;;  %s2184_s3 = inlined_call_operand.vmem [shape: f32[3,112,96], index: 3, kind: input, shape index: {}]   ;;  %s2185_s2 = inlined_call_operand.vmem [shape: f32[1,112], index: 2, kind: input, shape index: {}]   ;;  %s2186_s4 = inlined_call_operand.vmem [shape: f32[1,96], index: 4, kind: input, shape index: {}]   ;;  %s2187_s5 = inlined_call_operand.vmem [shape: f32[24,96], index: 5, kind: output, shape index: {}]  }
   0x1   :  { %v1236_v1 = vld [vmem:[%s2182_s1 + $0x78] sm:$0xff]  ;;  %v1235_v3 = vld [vmem:[%s2182_s1 + $0x70] sm:$0xff]  ;;  %v30_v5 = vunpack.c.l.s4 %v1570_v4  ;;  %v1234_v8 = vld [vmem:[%s2182_s1 + $0x68] sm:$0xff]  ;;  %vm107_vm2 = vcmask 1044484   ;;  %vm109_vm4 = vcmask 1046534   ;;  %vm223_vm6 = vcmask 523264  }
   0x2   :  { %v101_v2 = vld [vmem:[%s2182_s1 + $0x38] sm:$0xff]  ;;  %1386 = vmatprep.subr.mxu0 %v1236_v1  ;;  %v100_v6 = vld [vmem:[%s2182_s1 + $0x30] sm:$0xff]  ;;  %v33_v7 = vshrl.u32 %v32_v0, 7  ;;  %v99_v9 = vld [vmem:[%s2182_s1 + $0x28] sm:$0xff]  ;;  %vm1572_vm8 = vmmov 0   ;;  %vm830_vm9 = vcmask 916480  }
   0x3   :  { %1408 = vmatprep.subr.mxu1 %v101_v2  ;;  %1387 = vmatpush3.msra.mxu0 %v1236_v1  ;;  %v31_v10 = vunpack.c.0.s8 %v30_v5  ;;  %v1233_v11 = vld [vmem:[%s2182_s1 + $0x60] sm:$0xff]  ;;  %v1232_v14 = vld [vmem:[%s2182_s1 + $0x58] sm:$0xff]  ;;  %v21_v16 = vld [vmem:[%s2183_s0 + $0x8] sm:$0xff]  ;;  %vm1219_vm10 = vcmask 785408  }
   0x4   :  { %1409 = vmatpush3.msra.mxu1 %v101_v2  ;;  %1388 = vmatprep.subr.mxu0 %v1235_v3  ;;  %v98_v12 = vld [vmem:[%s2182_s1 + $0x20] sm:$0xff]  ;;  %v97_v17 = vld [vmem:[%s2182_s1 + $0x18] sm:$0xff]  ;;  %v1644_v18 = vld [vmem:[%s2183_s0 + $0x10] sm:$0xff]  ;;  %v45_v21 = vcombine.high %v21_v16, %v21_v16 }
   0x5   :  { %1410 = vmatprep.subr.mxu1 %v100_v6  ;;  %1389 = vmatpush3.msra.mxu0 %v1235_v3  ;;  %v1627_v13 = vsub.s32 %v31_v10, %v33_v7  ;;  %v20_v15 = vld [vmem:[%s2183_s0] sm:$0xff]  ;;  %vm106_vm3 = vmor %vm104_vm0, %vm105_vm1  ;;  %v61_v23 = vcombine.high %v1644_v18, %v1644_v18  ;;  %v1231_v25 = vld [vmem:[%s2182_s1 + $0x50] sm:$0xff] }
   0x6   :  { %1411 = vmatpush3.msra.mxu1 %v100_v6  ;;  %1390 = vmatprep.subr.mxu0 %v1234_v8  ;;  %v28_v19 = vcombine.high %v20_v15, %v20_v15  ;;  %vm108_vm5 = vmor %vm106_vm3, %vm107_vm2  ;;  %v96_v26 = vld [vmem:[%s2182_s1 + $0x10] sm:$0xff]  ;;  %v1230_v36 = vld [vmem:[%s2182_s1 + $0x48] sm:$0xff] }
   0x7   :  { %1412 = vmatprep.subr.mxu1 %v99_v9  ;;  %1391 = vmatpush3.msra.mxu0 %v1234_v8  ;;  %v35_v20 = vrot.slane %v20_v15, %v1627_v13  ;;  %v1650_v22 = vrot.slane %v21_v16, %v1627_v13  ;;  %v1657_v24 = vrot.slane %v1644_v18, %v1627_v13  ;;  %vm1674_vm7 = vmor %vm108_vm5, %vm109_vm4  ;;  %v95_v37 = vld [vmem:[%s2182_s1 + $0x8] sm:$0xff]  ;;  %v1229_v46 = vld [vmem:[%s2182_s1 + $0x40] sm:$0xff] }
   0x8   :  { %1413 = vmatpush3.msra.mxu1 %v99_v9  ;;  %1392 = vmatprep.subr.mxu0 %v1233_v11  ;;  %v1666_v27 = vrot.slane %v28_v19, %v1627_v13  ;;  %v1671_v29 = vrot.slane %v45_v21, %v1627_v13  ;;  %v94_v47 = vld [vmem:[%s2182_s1] sm:$0xff]  ;;  %v1252_v59 = vld [vmem:[%s2182_s1 + $0xb8] sm:$0xff] }
   0x9   :  { %1414 = vmatprep.subr.mxu1 %v98_v12  ;;  %1393 = vmatpush3.msra.mxu0 %v1233_v11  ;;  %v1668_v28 = vcombine.high %v35_v20, %v35_v20  ;;  %v1227_v30 = vrot.slane %v35_v20, 9  ;;  %v122_v32 = vrot.slane %v1650_v22, 7  ;;  %v1681_v33 = vcombine.high %v1650_v22, %v1650_v22  ;;  %v23_v1 = vld [vmem:[%s2183_s0 + $0x18] sm:$0xff] }
   0xa   :  { %1415 = vmatpush3.msra.mxu1 %v98_v12  ;;  %1394 = vmatprep.subr.mxu0 %v1232_v14  ;;  %v1685_v34 = vcombine.high %v1657_v24, %v1657_v24  ;;  %v1228_v35 = vrot.slane %v1657_v24, 9  ;;  %v1696_v38 = vcombine.high %v1666_v27, %v1666_v27  ;;  %v116_v40 = vrot.slane %v1666_v27, 7 }
   0xb   :  { %1416 = vmatprep.subr.mxu1 %v97_v17  ;;  %1395 = vmatpush3.msra.mxu0 %v1232_v14  ;;  %v113_v39 = vrot.slane %v1668_v28, 7  ;;  %v317_v41 = vcombine.low %v35_v20, %v1668_v28  ;;  %v124_v42 = vrot.slane %v122_v32, 2  ;;  %v102_v43 = vcombine.high %v1671_v29, %v1671_v29 }
   0xc   :  { %1417 = vmatpush3.msra.mxu1 %v97_v17  ;;  %1396 = vmatprep.subr.mxu0 %v1231_v25  ;;  %v125_v44 = vrot.slane %v1681_v33, 7  ;;  %v128_v45 = vrot.slane %v1671_v29, 7  ;;  %v118_v50 = vrot.slane %v116_v40, 2  ;;  %v119_v51 = vrot.slane %v1696_v38, 7 }
   0xd   :  { %1418 = vmatprep.subr.mxu1 %v96_v26  ;;  %1397 = vmatpush3.msra.mxu0 %v1231_v25  ;;  %v114_v48 = vsel %vm1674_vm7, %v1227_v30, %v113_v39  ;;  %v115_v49 = vrot.slane %v113_v39, 2  ;;  %v318_v52 = vcombine.low %v1666_v27, %v1696_v38  ;;  %v325_v53 = vrot.slane %v317_v41, %v1627_v13 }
   0xe   :  { %1419 = vmatpush3.msra.mxu1 %v96_v26  ;;  %1398 = vmatprep.subr.mxu0 %v1230_v36  ;;  %v126_v54 = vsel %vm1674_vm7, %v124_v42, %v125_v44  ;;  %v127_v55 = vrot.slane %v125_v44, 2  ;;  %v120_v57 = vsel %vm1674_vm7, %v118_v50, %v119_v51  ;;  %v121_v58 = vrot.slane %v119_v51, 2  ;;  %v1251_v42 = vld [vmem:[%s2182_s1 + $0xb0] sm:$0xff]  ;;  %v1250_v50 = vld [vmem:[%s2182_s1 + $0xa8] sm:$0xff] }
   0xf   :  { %1420 = vmatprep.subr.mxu1 %v95_v37  ;;  %1399 = vmatpush3.msra.mxu0 %v1230_v36  ;;  %v117_v56 = vsel %vm1674_vm7, %v115_v49, %v116_v40  ;;  %v130_v60 = vrot.slane %v128_v45, 2  ;;  %v332_v62 = vrot.slane %v318_v52, %v1627_v13  ;;  %v131_v0 = vrot.slane %v102_v43, 7 }
  0x10   :  { %1421 = vmatpush3.msra.mxu1 %v95_v37  ;;  %1400 = vmatprep.subr.mxu0 %v1229_v46  ;;  %v164_v61 = vcombine.low %v114_v48, %v117_v56  ;;  %v129_v63 = vsel %vm1674_vm7, %v127_v55, %v128_v45  ;;  %v123_v2 = vsel %vm1674_vm7, %v121_v58, %v122_v32  ;;  %v135_v3 = vrot.slane %v1685_v34, 7 }
  0x11   :  { %1422 = vmatprep.subr.mxu1 %v94_v47  ;;  %1401 = vmatpush3.msra.mxu0 %v1229_v46  ;;  %v181_v4 = vcombine.low %v126_v54, %v129_v63  ;;  %v334_v5 = vcombine.low %v1650_v22, %v1681_v33  ;;  %v165_v6 = vcombine.low %v120_v57, %v123_v2  ;;  %v1248_v2 = vld [vmem:[%s2182_s1 + $0x98] sm:$0xff] }
  0x12   :  { %1423 = vmatpush3.msra.mxu1 %v94_v47  ;;  %v172_v7 = vrot.slane %v164_v61, %v1627_v13  ;;  %v333_v8 = vcombine.low %v325_v53, %v332_v62  ;;  %1430 = vmatprep.subr.mxu0 %v1252_v59  ;;  %v132_v9 = vsel %vm1674_vm7, %v130_v60, %v131_v0  ;;  %v137_v21 = vrot.slane %v135_v3, 2 }
  0x13   :  { %v136_v10 = vsel %vm1674_vm7, %v1228_v35, %v135_v3  ;;  %v189_v11 = vrot.slane %v181_v4, %v1627_v13  ;;  %v335_v12 = vcombine.low %v1671_v29, %v1657_v24  ;;  %v342_v14 = vrot.slane %v334_v5, %v1627_v13 }
  0x14   :  { %v179_v15 = vrot.slane %v165_v6, %v1627_v13  ;;  %1424 = vmatprep.mubr.msk.f32.mxu1 %vm223_vm6, %v333_v8  ;;  %v182_v16 = vcombine.low %v132_v9, %v136_v10  ;;  %v1752_v17 = vrot.slane %v61_v23, %v1627_v13  ;;  %v1755_v19 = vrot.slane %v23_v1, %v1627_v13 }
  0x15   :  { %v349_v20 = vrot.slane %v335_v12, %v1627_v13  ;;  %v78_v25 = vcombine.high %v23_v1, %v23_v1  ;;  %v478_v26 = vcombine.low %v1668_v28, %v1666_v27  ;;  %v479_v53 = vcombine.low %v1696_v38, %v1650_v22  ;;  %v1246_v12 = vld [vmem:[%s2182_s1 + $0x88] sm:$0xff] }
  0x16   :  { %v180_v30 = vcombine.low %v172_v7, %v179_v15  ;;  %v196_v32 = vrot.slane %v182_v16, %v1627_v13  ;;  %v1763_v35 = vcombine.high %v1752_v17, %v1752_v17  ;;  %v1767_v18 = vcombine.high %v1755_v19, %v1755_v19 }
  0x17   :  { %v350_v23 = vcombine.low %v342_v14, %v349_v20  ;;  %v138_v36 = vrot.slane %v1752_v17, 7  ;;  %v144_v37 = vrot.slane %v1755_v19, 7  ;;  %v351_v39 = vcombine.low %v1685_v34, %v1752_v17 }
  0x18   :  { %1402 = vmatprep.mubr.msk.f32.mxu0 %vm223_vm6, %v180_v30  ;;  %v197_v27 = vcombine.low %v189_v11, %v196_v32  ;;  %v141_v28 = vrot.slane %v1763_v35, 7  ;;  %v147_v40 = vrot.slane %v1767_v18, 7  ;;  %v352_v41 = vcombine.low %v1763_v35, %v1755_v19  ;;  %v725_v32 = vld [vmem:[%s2184_s3 + $0x68] sm:$0xff] }
  0x19   :  { %1425 = vmatmul.mubr.msk.f32.vlgmr.msra.gmra.mxu1 %vm223_vm6, %v350_v23  ;;  %v139_v43 = vsel %vm1674_vm7, %v137_v21, %v138_v36  ;;  %v140_v34 = vrot.slane %v138_v36, 2  ;;  %v146_v44 = vrot.slane %v144_v37, 2  ;;  %v359_v45 = vrot.slane %v351_v39, %v1627_v13  ;;  %v723_v23 = vld [vmem:[%s2184_s3 + $0x58] sm:$0xff]  ;;  %v1273_v36 = vld [vmem:[%s2184_s3 + $0xd0] sm:$0xff]  ;;  %v1272_v39 = vld [vmem:[%s2184_s3 + $0xc8] sm:$0xff] }
  0x1a   :  { %1403 = vmatmul.mubr.msk.f32.vlgmr.msra.gmra.mxu0 %vm223_vm6, %v197_v27  ;;  %v143_v46 = vrot.slane %v141_v28, 2  ;;  %v366_v47 = vrot.slane %v352_v41, %v1627_v13  ;;  %v1788_v48 = vrot.slane %v78_v25, %v1627_v13  ;;  %v149_v49 = vrot.slane %v147_v40, 2  ;;  %v721_v27 = vld [vmem:[%s2184_s3 + $0x48] sm:$0xff]  ;;  %v1270_v41 = vld [vmem:[%s2184_s3 + $0xb8] sm:$0xff] }
  0x1b   :  { %1431 = vmatpush3.msra.mxu0 %v1252_v59  ;;  %v142_v51 = vsel %vm1674_vm7, %v140_v34, %v141_v28  ;;  %v148_v52 = vsel %vm1674_vm7, %v146_v44, %v147_v40  ;;  %v486_v54 = vrot.slane %v478_v26, %v1627_v13  ;;  %v1249_v59 = vld [vmem:[%s2182_s1 + $0xa0] sm:$0xff]  ;;  %v493_v38 = vrot.slane %v479_v53, %v1627_v13  ;;  %v718_v34 = vld [vmem:[%s2184_s3 + $0x30] sm:$0xff]  ;;  %v1268_v44 = vld [vmem:[%s2184_s3 + $0xa8] sm:$0xff] }
  0x1c   :  { %1432 = vmatprep.subr.mxu0 %v1251_v42  ;;  %v145_v55 = vsel %vm1674_vm7, %v143_v46, %v144_v37  ;;  %v198_v56 = vcombine.low %v139_v43, %v142_v51  ;;  %v367_v57 = vcombine.low %v359_v45, %v366_v47  ;;  %v103_v58 = vcombine.high %v1788_v48, %v1788_v48  ;;  %v722_v37 = vld [vmem:[%s2184_s3 + $0x50] sm:$0xff]  ;;  %v1271_v28 = vld [vmem:[%s2184_s3 + $0xc0] sm:$0xff]  ;;  %v717_v45 = vld [vmem:[%s2184_s3 + $0x28] sm:$0xff] }
  0x1d   :  { %1433 = vmatpush3.msra.mxu0 %v1251_v42  ;;  %v199_v60 = vcombine.low %v145_v55, %v148_v52  ;;  %v150_v61 = vrot.slane %v1788_v48, 7  ;;  %v368_v22 = vcombine.low %v1767_v18, %v1788_v48  ;;  %v495_v0 = vcombine.low %v1681_v33, %v1671_v29  ;;  %v720_v40 = vld [vmem:[%s2184_s3 + $0x40] sm:$0xff]  ;;  %v719_v42 = vld [vmem:[%s2184_s3 + $0x38] sm:$0xff]  ;;  %v1269_v43 = vld [vmem:[%s2184_s3 + $0xb0] sm:$0xff] }
  0x1e   :  { %1434 = vmatprep.subr.mxu0 %v1250_v50  ;;  %v206_v62 = vrot.slane %v198_v56, %v1627_v13  ;;  %1427 = vmatprep.mubr.msk.f32.mxu1 %vm223_vm6, %v367_v57  ;;  %v153_v63 = vrot.slane %v103_v58, 7  ;;  %v1253_v1 = vcombine.high %v1671_v29, %v1657_v24  ;;  %v512_v33 = vcombine.low %v1752_v17, %v1763_v35  ;;  %v1247_v29 = vld [vmem:[%s2182_s1 + $0x90] sm:$0xff]  ;;  %v724_v35 = vld [vmem:[%s2184_s3 + $0x60] sm:$0xff]  ;;  %v1264_v52 = vld [vmem:[%s2184_s3 + $0x88] sm:$0xff] }
  0x1f   :  { %1435 = vmatpush3.msra.mxu0 %v1250_v50  ;;  %v213_v3 = vrot.slane %v199_v60, %v1627_v13  ;;  %v151_v4 = vsel %vm1674_vm7, %v149_v49, %v150_v61  ;;  %v152_v5 = vrot.slane %v150_v61, 2  ;;  %v375_v6 = vrot.slane %v368_v22, %v1627_v13  ;;  %v1267_v46 = vld [vmem:[%s2184_s3 + $0xa0] sm:$0xff]  ;;  %v715_v49 = vld [vmem:[%s2184_s3 + $0x18] sm:$0xff]  ;;  %v1265_v50 = vld [vmem:[%s2184_s3 + $0x90] sm:$0xff] }
  0x20   :  { %1436 = vmatprep.subr.mxu0 %v1249_v59  ;;  %v513_v8 = vcombine.low %v1755_v19, %v1767_v18  ;;  %v503_v10 = vrot.slane %v495_v0, %v1627_v13  ;;  %v510_v11 = vrot.slane %v1253_v1, %v1627_v13  ;;  %v494_v14 = vcombine.low %v486_v54, %v493_v38  ;;  %v1245_v19 = vld [vmem:[%s2182_s1 + $0x80] sm:$0xff]  ;;  %v1274_v18 = vld [vmem:[%s2184_s3 + $0xd8] sm:$0xff]  ;;  %v714_v51 = vld [vmem:[%s2184_s3 + $0x10] sm:$0xff] }
  0x21   :  { %1437 = vmatpush3.msra.mxu0 %v1249_v59  ;;  %v214_v7 = vcombine.low %v206_v62, %v213_v3  ;;  %v154_v24 = vsel %vm1674_vm7, %v152_v5, %v153_v63  ;;  %1428 = vmatmul.mubr.msk.f32.gmra.mxu1 %vm223_vm6, %v375_v6  ;;  %v520_v15 = vrot.slane %v512_v33, %v1627_v13  ;;  %v1571_v30 = vmov 0.0   ;;  %v716_v47 = vld [vmem:[%s2184_s3 + $0x20] sm:$0xff]  ;;  %v713_v53 = vld [vmem:[%s2184_s3 + $0x8] sm:$0xff]  ;;  %v1262_v56 = vld [vmem:[%s2184_s3 + $0x78] sm:$0xff] }
  0x22   :  { %1438 = vmatprep.subr.mxu0 %v1248_v2  ;;  %v215_v9 = vcombine.low %v151_v4, %v154_v24  ;;  %v527_v16 = vrot.slane %v513_v8, %v1627_v13  ;;  %v511_v20 = vcombine.low %v503_v10, %v510_v11  ;;  %v529_v21 = vcombine.low %v1788_v48, %v103_v58  ;;  %v1266_v48 = vld [vmem:[%s2184_s3 + $0x98] sm:$0xff]  ;;  %v1263_v54 = vld [vmem:[%s2184_s3 + $0x80] sm:$0xff]  ;;  %v1261_v57 = vld [vmem:[%s2184_s3 + $0x70] sm:$0xff] }
  0x23   :  { %1405 = vmatprep.mubr.msk.f32.mxu0 %vm223_vm6, %v214_v7  ;;  %1439 = vmatpush3.msra.mxu0 %v1248_v2  ;;  %v712_v55 = vld [vmem:[%s2184_s3] sm:$0xff] }
  0x24   :  { %v222_v17 = vrot.slane %v215_v9, %v1627_v13  ;;  %1440 = vmatprep.subr.mxu0 %v1247_v29  ;;  %v528_v25 = vcombine.low %v520_v15, %v527_v16  ;;  %v536_v26 = vrot.slane %v529_v21, %v1627_v13  ;;  %1452 = vmatprep.subr.mxu1 %v1571_v30  ;;  %v1258_v1 = vld [vmem:[%s2185_s2] ss:$0 sm:$0xff] }
  0x25   :  { %1441 = vmatpush3.msra.mxu0 %v1247_v29  ;;  %1453 = vmatpush3.msra.mxu1 %v1274_v18 }
  0x26   :  { %1406 = vmatmul.mubr.msk.f32.gmra.mxu0 %vm223_vm6, %v222_v17  ;;  %1442 = vmatprep.subr.mxu0 %v1246_v12 }
  0x27   :  { %1443 = vmatpush3.msra.mxu0 %v1246_v12  ;;  %1446 = vmatprep.mubr.msk.f32.mxu0 %vm223_vm6, %v494_v14 }
  0x28   :  { %1444 = vmatprep.subr.mxu0 %v1245_v19  ;;  %1454 = vmatprep.subr.mxu1 %v1571_v30 }
  0x29   :  { %1445 = vmatpush3.msra.mxu0 %v1245_v19  ;;  %1455 = vmatpush3.msra.mxu1 %v1273_v36 }
  0x2a   :  { %1447 = vmatmul.mubr.msk.f32.vlgmr.msra.gmra.mxu0 %vm223_vm6, %v511_v20  ;;  %1489 = vmatprep.subr.mxu0 %v1571_v30 }
  0x2b   :  { %1449 = vmatprep.mubr.msk.f32.mxu0 %vm223_vm6, %v528_v25  ;;  %1490 = vmatpush3.msra.mxu0 %v725_v32 }
  0x2c   :  { %1491 = vmatprep.subr.mxu0 %v1571_v30  ;;  %1456 = vmatprep.subr.mxu1 %v1571_v30 }
  0x2d   :  { %1492 = vmatpush3.msra.mxu0 %v724_v35  ;;  %1457 = vmatpush3.msra.mxu1 %v1272_v39 }
  0x2e   :  { %1450 = vmatmul.mubr.msk.f32.gmra.mxu0 %vm223_vm6, %v536_v26  ;;  %1493 = vmatprep.subr.mxu0 %v1571_v30 }
  0x2f   :  { %1494 = vmatpush3.msra.mxu0 %v723_v23  ;;  %1458 = vmatprep.subr.mxu1 %v1571_v30 }
  0x30   :  { %1495 = vmatprep.subr.mxu0 %v1571_v30  ;;  %1459 = vmatpush3.msra.mxu1 %v1271_v28 }
  0x31   :  { %1496 = vmatpush3.msra.mxu0 %v722_v37  ;;  %1460 = vmatprep.subr.mxu1 %v1571_v30 }
  0x32   :  { %1497 = vmatprep.subr.mxu0 %v1571_v30  ;;  %1461 = vmatpush3.msra.mxu1 %v1270_v41 }
  0x33   :  { %1498 = vmatpush3.msra.mxu0 %v721_v27  ;;  %1462 = vmatprep.subr.mxu1 %v1571_v30 }
  0x34   :  { %1499 = vmatprep.subr.mxu0 %v1571_v30  ;;  %1463 = vmatpush3.msra.mxu1 %v1269_v43 }
  0x35   :  { %1500 = vmatpush3.msra.mxu0 %v720_v40  ;;  %1464 = vmatprep.subr.mxu1 %v1571_v30 }
  0x36   :  { %1501 = vmatprep.subr.mxu0 %v1571_v30  ;;  %1465 = vmatpush3.msra.mxu1 %v1268_v44 }
  0x37   :  { %1502 = vmatpush3.msra.mxu0 %v719_v42  ;;  %1466 = vmatprep.subr.mxu1 %v1571_v30 }
  0x38   :  { %1503 = vmatprep.subr.mxu0 %v1571_v30  ;;  %1467 = vmatpush3.msra.mxu1 %v1267_v46 }
  0x39   :  { %1504 = vmatpush3.msra.mxu0 %v718_v34  ;;  %1468 = vmatprep.subr.mxu1 %v1571_v30 }
  0x3a   :  { %1505 = vmatprep.subr.mxu0 %v1571_v30  ;;  %1469 = vmatpush3.msra.mxu1 %v1266_v48 }
  0x3b   :  { %1506 = vmatpush3.msra.mxu0 %v717_v45  ;;  %1470 = vmatprep.subr.mxu1 %v1571_v30 }
  0x3c   :  { %1507 = vmatprep.subr.mxu0 %v1571_v30  ;;  %1471 = vmatpush3.msra.mxu1 %v1265_v50 }
  0x3d   :  { %1508 = vmatpush3.msra.mxu0 %v716_v47  ;;  %1472 = vmatprep.subr.mxu1 %v1571_v30 }
  0x3e   :  { %1509 = vmatprep.subr.mxu0 %v1571_v30  ;;  %1473 = vmatpush3.msra.mxu1 %v1264_v52 }
  0x3f   :  { %1510 = vmatpush3.msra.mxu0 %v715_v49  ;;  %1474 = vmatprep.subr.mxu1 %v1571_v30 }
  0x40   :  { %1511 = vmatprep.subr.mxu0 %v1571_v30  ;;  %1475 = vmatpush3.msra.mxu1 %v1263_v54 }
  0x41   :  { %1512 = vmatpush3.msra.mxu0 %v714_v51  ;;  %1517 = vmatprep.mubr.msk.f32.mxu0 %vm1572_vm8, %v1571_v30 }
  0x42   :  { %1513 = vmatprep.subr.mxu0 %v1571_v30  ;;  %1476 = vmatprep.subr.mxu1 %v1571_v30 }
  0x43   :  { %1514 = vmatpush3.msra.mxu0 %v713_v53  ;;  %1477 = vmatpush3.msra.mxu1 %v1262_v56 }
  0x44   :  { %1515 = vmatprep.subr.mxu0 %v1571_v30  ;;  %1480 = vmatprep.mubr.msk.f32.mxu1 %vm1572_vm8, %v1571_v30 }
  0x45   :  { %1516 = vmatpush3.msra.mxu0 %v712_v55  ;;  %1478 = vmatprep.subr.mxu1 %v1571_v30 }
  0x46   :  { %1479 = vmatpush3.msra.mxu1 %v1261_v57 }
  0x47   :  { %1526 = vmatprep.subr.mxu1 %v1571_v30 }
  0xd9   :  { %v1426_v59 = vpop.f32.mrf.mxu1 }
  0xda   :  { %v1404_v58 = vpop.f32.mrf.mxu0 }
  0xdb   :  { %v450_v22 = vpop.f32.mrf.mxu1  ;;  %v456_v62 = vadd.f32 %v1426_v59, %v1404_v58 }
  0xdc   :  { %v298_v60 = vpop.f32.mrf.mxu0 }
  0xdd   :  { %v451_v2 = vadd.f32 %v450_v22, %v298_v60 }
  0xe1   :  { %v1429_v63 = vpop.f32.mrf.mxu1 }
  0xe3   :  { %v460_v6 = vpop.f32.mrf.mxu1 }
  0xe6   :  { %v1407_v61 = vpop.f32.mrf.mxu0 }
  0xe7   :  { %v466_v5 = vadd.f32 %v1429_v63, %v1407_v61 }
  0xe8   :  { %v308_v38 = vpop.f32.mrf.mxu0 }
  0xe9   :  { %v461_v10 = vadd.f32 %v460_v6, %v308_v38 }
  0xea   :  { %v1448_v0 = vpop.f32.mrf.mxu0 }
  0xeb   :  { %v631_v3 = vadd.f32 %v1448_v0, %v456_v62 }
  0xec   :  { %v611_v4 = vpop.f32.mrf.mxu0 }
  0xed   :  { %v642_v33 = vadd.f32 %v1258_v1, %v631_v3  ;;  %v630_v7 = vadd.f32 %v611_v4, %v451_v2 }
  0xee   :  { %v1451_v24 = vpop.f32.mrf.mxu0 }
  0xef   :  { %v646_v29 = vmax.f32 %v642_v33, 0.0  ;;  %v641_v8 = vadd.f32 %v1258_v1, %v630_v7  ;;  %v633_v9 = vadd.f32 %v1451_v24, %v466_v5 }
  0xf0   :  { %v621_v11 = vpop.f32.mrf.mxu0 }
  0xf1   :  { %v670_v12 = vcombine.high %v646_v29, %v646_v29  ;;  %v1974_v14 = vrot.slane %v646_v29, %v1627_v13  ;;  %v645_v15 = vmax.f32 %v641_v8, 0.0  ;;  %v644_v16 = vadd.f32 %v1258_v1, %v633_v9 }
  0xf2   :  { %v632_v17 = vadd.f32 %v621_v11, %v461_v10 }
  0xf3   :  { %v1977_v19 = vrot.slane %v670_v12, %v1627_v13  ;;  %v737_v20 = vrot.slane %v1974_v14, 7  ;;  %v653_v21 = vcombine.high %v645_v15, %v645_v15  ;;  %v660_v25 = vrot.slane %v645_v15, %v1627_v13 }
  0xf4   :  { %v648_v26 = vmax.f32 %v644_v16, 0.0  ;;  %v643_v32 = vadd.f32 %v1258_v1, %v632_v17  ;;  %v1986_v18 = vcombine.high %v1974_v14, %v1974_v14 }
  0xf5   :  { %v1982_v35 = vrot.slane %v653_v21, %v1627_v13  ;;  %v686_v23 = vcombine.high %v1977_v19, %v1977_v19  ;;  %v1990_v36 = vcombine.high %v660_v25, %v660_v25  ;;  %v739_v39 = vrot.slane %v737_v20, 2 }
  0xf6   :  { %v1993_v37 = vrot.slane %v648_v26, %v1627_v13  ;;  %v1259_v40 = vrot.slane %v660_v25, 9  ;;  %v647_v43 = vmax.f32 %v643_v32, 0.0  ;;  %v743_v47 = vrot.slane %v1977_v19, 7 }
  0xf7   :  { %v1997_v27 = vcombine.high %v1982_v35, %v1982_v35  ;;  %v731_v28 = vrot.slane %v1982_v35, 7  ;;  %v728_v41 = vrot.slane %v1990_v36, 7  ;;  %v917_v42 = vcombine.low %v660_v25, %v1990_v36 }
  0xf8   :  { %v2007_v46 = vcombine.high %v1993_v37, %v1993_v37  ;;  %v1260_v48 = vrot.slane %v686_v23, 9  ;;  %v934_v50 = vcombine.low %v1974_v14, %v1986_v18  ;;  %v687_v57 = vcombine.high %v647_v43, %v647_v43 }
  0xf9   :  { %v733_v34 = vrot.slane %v731_v28, 2  ;;  %v734_v44 = vrot.slane %v1997_v27, 7  ;;  %v918_v45 = vcombine.low %v1982_v35, %v1997_v27  ;;  %v730_v49 = vrot.slane %v728_v41, 2 }
  0xfa   :  { %v729_v51 = vsel %vm1674_vm7, %v1259_v40, %v728_v41  ;;  %v925_v53 = vrot.slane %v917_v42, %v1627_v13  ;;  %v2021_v58 = vrot.slane %v647_v43, %v1627_v13  ;;  %v759_v61 = vrot.slane %v1993_v37, 7  ;;  %v1294_v40 = vld [vmem:[%s2184_s3 + $0x148] sm:$0xff] }
  0xfb   :  { %v736_v52 = vrot.slane %v734_v44, 2  ;;  %v932_v54 = vrot.slane %v918_v45, %v1627_v13  ;;  %v732_v55 = vsel %vm1674_vm7, %v730_v49, %v731_v28  ;;  %v735_v56 = vsel %vm1674_vm7, %v733_v34, %v734_v44  ;;  %v1293_v44 = vld [vmem:[%s2184_s3 + $0x140] sm:$0xff] }
  0xfc   :  { %v779_v59 = vcombine.low %v729_v51, %v732_v55  ;;  %v762_v22 = vrot.slane %v2007_v46, 7  ;;  %v2026_v38 = vrot.slane %v687_v57, %v1627_v13  ;;  %v2030_v62 = vcombine.high %v2021_v58, %v2021_v58 }
  0xfd   :  { %v933_v60 = vcombine.low %v925_v53, %v932_v54  ;;  %v747_v63 = vrot.slane %v2021_v58, 7  ;;  %v935_v0 = vcombine.low %v686_v23, %v2021_v58  ;;  %v942_v2 = vrot.slane %v934_v50, %v1627_v13 }
  0xfe   :  { %v787_v1 = vrot.slane %v779_v59, %v1627_v13  ;;  %v738_v3 = vsel %vm1674_vm7, %v736_v52, %v737_v20  ;;  %v740_v4 = vrot.slane %v1986_v18, 7  ;;  %v2042_v5 = vcombine.high %v2026_v38, %v2026_v38  ;;  %v1292_v52 = vld [vmem:[%s2184_s3 + $0x138] sm:$0xff] }
  0xff   :  { %1518 = vmatmul.mubr.msk.f32.vlgmr.msra.gmra.mxu0 %vm830_vm9, %v933_v60  ;;  %v749_v6 = vrot.slane %v747_v63, 2  ;;  %v753_v33 = vrot.slane %v2026_v38, 7  ;;  %v949_v7 = vrot.slane %v935_v0, %v1627_v13  ;;  %v780_v24 = vcombine.low %v735_v56, %v738_v3  ;;  %v1291_v56 = vld [vmem:[%s2184_s3 + $0x130] sm:$0xff]  ;;  %v1290_v60 = vld [vmem:[%s2184_s3 + $0x128] sm:$0xff]  ;;  %v1284_v3 = vld [vmem:[%s2184_s3 + $0xf8] sm:$0xff] }
 0x100   :  { %1520 = vmatprep.mubr.msk.f32.mxu0 %vm1572_vm8, %v1571_v30  ;;  %v951_v29 = vcombine.low %v2030_v62, %v2026_v38  ;;  %v741_v8 = vsel %vm1674_vm7, %v739_v39, %v740_v4  ;;  %v742_v9 = vrot.slane %v740_v4, 2  ;;  %v952_v11 = vcombine.low %v2042_v5, %v1993_v37  ;;  %v1286_v0 = vld [vmem:[%s2184_s3 + $0x108] sm:$0xff] }
 0x101   :  { %v950_v10 = vcombine.low %v942_v2, %v949_v7  ;;  %v748_v12 = vsel %vm1674_vm7, %v1260_v48, %v747_v63  ;;  %v750_v15 = vrot.slane %v2030_v62, 7  ;;  %v794_v16 = vrot.slane %v780_v24, %v1627_v13  ;;  %v1287_v63 = vld [vmem:[%s2184_s3 + $0x110] sm:$0xff] }
 0x102   :  { %v959_v17 = vrot.slane %v951_v29, %v1627_v13  ;;  %v744_v20 = vsel %vm1674_vm7, %v742_v9, %v743_v47  ;;  %v755_v21 = vrot.slane %v753_v33, 2  ;;  %v966_v25 = vrot.slane %v952_v11, %v1627_v13 }
 0x103   :  { %1521 = vmatmul.mubr.msk.f32.gmra.mxu0 %vm830_vm9, %v950_v10  ;;  %v751_v26 = vsel %vm1674_vm7, %v749_v6, %v750_v15  ;;  %v796_v32 = vcombine.low %v741_v8, %v744_v20  ;;  %v752_v23 = vrot.slane %v750_v15, 2  ;;  %v761_v39 = vrot.slane %v759_v61, 2  ;;  %v1283_v6 = vld [vmem:[%s2184_s3 + $0xf0] sm:$0xff] }
 0x104   :  { %v795_v28 = vcombine.low %v787_v1, %v794_v16  ;;  %1523 = vmatprep.mubr.msk.f32.mxu0 %vm1572_vm8, %v1571_v30  ;;  %v797_v41 = vcombine.low %v748_v12, %v751_v26  ;;  %v756_v42 = vrot.slane %v2042_v5, 7  ;;  %v967_v43 = vcombine.low %v959_v17, %v966_v25  ;;  %v1285_v1 = vld [vmem:[%s2184_s3 + $0x100] sm:$0xff] }
 0x105   :  { %v754_v34 = vsel %vm1674_vm7, %v752_v23, %v753_v33  ;;  %v804_v45 = vrot.slane %v796_v32, %v1627_v13  ;;  %v763_v54 = vsel %vm1674_vm7, %v761_v39, %v762_v22  ;;  %v1288_v22 = vld [vmem:[%s2184_s3 + $0x118] sm:$0xff]  ;;  %v1070_v2 = vcombine.low %v1997_v27, %v1974_v14  ;;  %v1282_v14 = vld [vmem:[%s2184_s3 + $0xe8] sm:$0xff] }
 0x106   :  { %1481 = vmatmul.mubr.msk.f32.vlgmr.msra.gmra.mxu1 %vm830_vm9, %v795_v28  ;;  %v811_v47 = vrot.slane %v797_v41, %v1627_v13  ;;  %v757_v48 = vsel %vm1674_vm7, %v755_v21, %v756_v42  ;;  %v758_v49 = vrot.slane %v756_v42, 2  ;;  %v1069_v4 = vcombine.low %v1990_v36, %v1982_v35  ;;  %v1281_v36 = vld [vmem:[%s2184_s3 + $0xe0] sm:$0xff] }
 0x107   :  { %1527 = vmatpush3.msra.mxu1 %v1294_v40  ;;  %1483 = vmatprep.mubr.msk.f32.mxu1 %vm1572_vm8, %v1571_v30  ;;  %v813_v50 = vcombine.low %v754_v34, %v757_v48  ;;  %v1084_v27 = vrot.slane %v1070_v2, %v1627_v13  ;;  %v1087_v33 = vcombine.low %v2021_v58, %v2030_v62 }
 0x108   :  { %1528 = vmatprep.subr.mxu1 %v1571_v30  ;;  %1524 = vmatmul.mubr.msk.f32.gmra.mxu0 %vm830_vm9, %v967_v43  ;;  %v812_v51 = vcombine.low %v804_v45, %v811_v47  ;;  %v760_v53 = vsel %vm1674_vm7, %v758_v49, %v759_v61  ;;  %v1289_v61 = vld [vmem:[%s2184_s3 + $0x120] sm:$0xff]  ;;  %v1077_v35 = vrot.slane %v1069_v4, %v1627_v13 }
 0x109   :  { %1529 = vmatpush3.msra.mxu1 %v1293_v44  ;;  %v814_v55 = vcombine.low %v760_v53, %v763_v54  ;;  %v821_v57 = vrot.slane %v813_v50, %v1627_v13  ;;  %v1086_v7 = vcombine.low %v1986_v18, %v1977_v19  ;;  %v1101_v29 = vrot.slane %v1087_v33, %v1627_v13 }
 0x10a   :  { %1530 = vmatprep.subr.mxu1 %v1571_v30  ;;  %1484 = vmatmul.mubr.msk.f32.gmra.mxu1 %vm830_vm9, %v812_v51  ;;  %v1085_v24 = vcombine.low %v1077_v35, %v1084_v27  ;;  %v1103_v58 = vcombine.low %v2026_v38, %v2042_v5  ;;  %v1104_v8 = vcombine.low %v1993_v37, %v2007_v46 }
 0x10b   :  { %1531 = vmatpush3.msra.mxu1 %v1292_v52  ;;  %1486 = vmatprep.mubr.msk.f32.mxu1 %vm1572_vm8, %v1571_v30  ;;  %v828_v59 = vrot.slane %v814_v55, %v1627_v13  ;;  %v1094_v62 = vrot.slane %v1086_v7, %v1627_v13 }
 0x10c   :  { %1532 = vmatprep.subr.mxu1 %v1571_v30  ;;  %v1111_v18 = vrot.slane %v1103_v58, %v1627_v13  ;;  %v1118_v9 = vrot.slane %v1104_v8, %v1627_v13 }
 0x10d   :  { %1533 = vmatpush3.msra.mxu1 %v1291_v56  ;;  %v829_v31 = vcombine.low %v821_v57, %v828_v59  ;;  %v1102_v19 = vcombine.low %v1094_v62, %v1101_v29 }
 0x10e   :  { %1534 = vmatprep.subr.mxu1 %v1571_v30  ;;  %v1119_v38 = vcombine.low %v1111_v18, %v1118_v9 }
 0x10f   :  { %1487 = vmatmul.mubr.msk.f32.gmra.mxu1 %vm830_vm9, %v829_v31 }
 0x110   :  { %1535 = vmatpush3.msra.mxu1 %v1290_v60  ;;  %1554 = vmatprep.mubr.msk.f32.mxu1 %vm1572_vm8, %v1571_v30 }
 0x111   :  { %1536 = vmatprep.subr.mxu1 %v1571_v30 }
 0x112   :  { %1537 = vmatpush3.msra.mxu1 %v1289_v61 }
 0x113   :  { %1538 = vmatprep.subr.mxu1 %v1571_v30 }
 0x114   :  { %1539 = vmatpush3.msra.mxu1 %v1288_v22 }
 0x115   :  { %1540 = vmatprep.subr.mxu1 %v1571_v30 }
 0x116   :  { %1541 = vmatpush3.msra.mxu1 %v1287_v63 }
 0x117   :  { %1542 = vmatprep.subr.mxu1 %v1571_v30 }
 0x118   :  { %1543 = vmatpush3.msra.mxu1 %v1286_v0 }
 0x119   :  { %1544 = vmatprep.subr.mxu1 %v1571_v30 }
 0x11a   :  { %1545 = vmatpush3.msra.mxu1 %v1285_v1 }
 0x11b   :  { %1546 = vmatprep.subr.mxu1 %v1571_v30 }
 0x11c   :  { %1547 = vmatpush3.msra.mxu1 %v1284_v3 }
 0x11d   :  { %1548 = vmatprep.subr.mxu1 %v1571_v30 }
 0x11e   :  { %1549 = vmatpush3.msra.mxu1 %v1283_v6 }
 0x11f   :  { %1550 = vmatprep.subr.mxu1 %v1571_v30 }
 0x120   :  { %1551 = vmatpush3.msra.mxu1 %v1282_v14 }
 0x121   :  { %1552 = vmatprep.subr.mxu1 %v1571_v30 }
 0x122   :  { %1553 = vmatpush3.msra.mxu1 %v1281_v36 }
 0x123   :  { %1555 = vmatmul.mubr.msk.f32.vlgmr.msra.gmra.mxu1 %vm830_vm9, %v1085_v24 }
 0x124   :  { %1557 = vmatprep.mubr.msk.f32.mxu1 %vm1572_vm8, %v1571_v30 }
 0x127   :  { %1558 = vmatmul.mubr.msk.f32.gmra.mxu1 %vm830_vm9, %v1102_v19 }
 0x128   :  { %1560 = vmatprep.mubr.msk.f32.mxu1 %vm1572_vm8, %v1571_v30  ;;  %v1298_v30 = vld [vmem:[%s2186_s4] ss:$0 sm:$0xff] }
 0x12b   :  { %1561 = vmatmul.mubr.msk.f32.gmra.mxu1 %vm830_vm9, %v1119_v38 }
 0x1bf   :  { %v1040_v5 = vpop.f32.mrf.mxu0 }
 0x1c1   :  { %v1519_v10 = vpop.f32.mrf.mxu0 }
 0x1c3   :  { %v1045_v11 = vpop.f32.mrf.mxu0 }
 0x1c5   :  { %v1522_v37 = vpop.f32.mrf.mxu0 }
 0x1c6   :  { %v903_v46 = vpop.f32.mrf.mxu1 }
 0x1c7   :  { %v1041_v26 = vadd.f32 %v1040_v5, %v903_v46 }
 0x1c8   :  { %v1482_v12 = vpop.f32.mrf.mxu1  ;;  %v1050_v15 = vpop.f32.mrf.mxu0 }
 0x1ca   :  { %v908_v16 = vpop.f32.mrf.mxu1  ;;  %v1525_v17 = vpop.f32.mrf.mxu0 }
 0x1cb   :  { %v1046_v39 = vadd.f32 %v1045_v11, %v908_v16 }
 0x1cc   :  { %v1485_v20 = vpop.f32.mrf.mxu1 }
 0x1cf   :  { %v913_v21 = vpop.f32.mrf.mxu1 }
 0x1d0   :  { %v1051_v43 = vadd.f32 %v1050_v15, %v913_v21 }
 0x1d1   :  { %v1488_v25 = vpop.f32.mrf.mxu1 }
 0x1e3   :  { %v1192_v13 = vpop.f32.mrf.mxu1 }
 0x1e4   :  { %v1206_v32 = vadd.f32 %v1192_v13, %v1041_v26 }
 0x1e5   :  { %v1556_v23 = vpop.f32.mrf.mxu1 }
 0x1e6   :  { %v1216_v28 = vadd.f32 %v1298_v30, %v1206_v32 }
 0x1e7   :  { %v1197_v40 = vpop.f32.mrf.mxu1 }
 0x1e8   :  { %1220 = vst.msk [vmem:[%s2187_s5] sm:$0xff] %vm1219_vm10, %v1216_v28  ;;  %v1207_v41 = vadd.f32 %v1197_v40, %v1046_v39 }
 0x1e9   :  { %v1559_v42 = vpop.f32.mrf.mxu1 }
 0x1ea   :  { %v1217_v34 = vadd.f32 %v1298_v30, %v1207_v41 }
 0x1eb   :  { %v1202_v44 = vpop.f32.mrf.mxu1 }
 0x1ec   :  { %1221 = vst.msk [vmem:[%s2187_s5 + $0x8] sm:$0xff] %vm1219_vm10, %v1217_v34  ;;  %v1208_v45 = vadd.f32 %v1202_v44, %v1051_v43 }
 0x1ed   :  { %v1562_v47 = vpop.f32.mrf.mxu1 }
 0x1ee   :  { %v1218_v48 = vadd.f32 %v1298_v30, %v1208_v45 }
 0x1f0   :  { %1222 = vst.msk [vmem:[%s2187_s5 + $0x10] sm:$0xff] %vm1219_vm10, %v1218_v48 }

</bundles_post_ra>
